<compile_context>
chip_gen: v7x
topology: tpu7x:2x2x1
jax: 0.10.0
libtpu: 0.0.40
codegen_flags: <defaults>
</compile_context>

<pallas_src>
import functools

import jax
import jax.numpy as jnp
from jax.experimental import pallas as pl
from jax.experimental.pallas import tpu as pltpu

_SUBLANE = 8                      # batch tiles are multiples of 8 sublanes
_VMEM_LIMIT_BYTES = 48 << 20      # safe on v7x (64 MiB physical), v5e/v6e (128 MiB)
_RESIDENT_WEIGHT_BUDGET = 24 << 20  # conservative all-generations ceiling


def _round_up(x: int, m: int) -> int:
    return (x + m - 1) // m * m


# --------------------------------------------------------------------------
# Fused MLP kernel: refs = (x, w0, b0, w1, b1, ..., w_{L-1}, b_{L-1}, out)
# --------------------------------------------------------------------------
def _mlp_kernel(*refs, num_layers: int):
    x_ref = refs[0]
    o_ref = refs[-1]
    h = x_ref[...].astype(jnp.float32)
    for layer in range(num_layers):
        w_ref = refs[1 + 2 * layer]
        b_ref = refs[2 + 2 * layer]
        # bf16 operands, f32 MXU accumulation.
        h = jnp.dot(h.astype(w_ref.dtype), w_ref[...],
                    preferred_element_type=jnp.float32)
        h = h + b_ref[...]          # (1, Dout) broadcasts over the batch tile
        h = jnp.maximum(h, 0.0)     # ReLU follows every Linear in this module
    o_ref[...] = h.astype(o_ref.dtype)


# --------------------------------------------------------------------------
# Parameter init (mimics nn.Linear default: uniform in +/- 1/sqrt(fan_in)),
# stored as (in_features, out_features) so y = x @ W + b.
# --------------------------------------------------------------------------
def init_encoder_params(key, input_dim, embed_dim, hidden_dims):
    dims = [input_dim] + list(hidden_dims) + [embed_dim]
    params = []
    for i in range(len(dims) - 1):
        fan_in, fan_out = dims[i], dims[i + 1]
        key, kw, kb = jax.random.split(key, 3)
        bound = 1.0 / jnp.sqrt(fan_in)
        w = jax.random.uniform(kw, (fan_in, fan_out), jnp.float32,
                               minval=-bound, maxval=bound)
        b = jax.random.uniform(kb, (fan_out,), jnp.float32,
                               minval=-bound, maxval=bound)
        params.append((w, b))
    return params


def prepare_params(params):
    """Device-side layout: bf16 weights (halve DMA/VMEM), f32 (1, Dout) biases.
    No feature-dim padding: full-array blocks are legal at any size."""
    prepared = []
    for w, b in params:
        prepared.append((w.astype(jnp.bfloat16),
                         b.reshape(1, -1).astype(jnp.float32)))
    return prepared


# --------------------------------------------------------------------------
# Wrapper: one pallas_call for the whole encoder forward.
# --------------------------------------------------------------------------
def _const_spec(shape, single_buffered):
    if single_buffered:
        # Constant index_map + single buffering: weights stay VMEM-resident
        # with no second buffer allocated.
        return pl.BlockSpec(shape, lambda i: (0, 0),
                            pipeline_mode=pl.Buffered(1))
    return pl.BlockSpec(shape, lambda i: (0, 0))


def encoder_forward(x, dev_params, *, max_block_batch=512):
    B, din = x.shape
    embed_dim = dev_params[-1][0].shape[1]
    num_layers = len(dev_params)

    # Resident-weight guard: this all-weights-in-VMEM design only works while
    # the (single-buffered) weights comfortably fit VMEM on every generation.
    weight_bytes = sum(w.size * w.dtype.itemsize + b.size * b.dtype.itemsize
                       for w, b in dev_params)
    if weight_bytes > _RESIDENT_WEIGHT_BUDGET:
        # TODO(synk): for large hidden dims, tile weights over a K/N grid axis
        # or stream them with pltpu.emit_pipeline instead of failing.
        raise NotImplementedError("resident-weight footprint exceeds VMEM budget")

    # Batch tile: multiple of 8 sublanes; when B >= 16, use >= 2 grid steps so
    # the "parallel" axis spans both v7x TensorCores (no-op on v5e/v6e).
    if B >= 16:
        tb = _round_up(pl.cdiv(B, 2), _SUBLANE)
    else:
        tb = _round_up(B, _SUBLANE)
    tb = max(_SUBLANE, min(tb, max_block_batch))
    grid = (pl.cdiv(B, tb),)   # ragged last tile: OOB output rows are discarded

    kernel = functools.partial(_mlp_kernel, num_layers=num_layers)

    flat_args = [x]
    for w, b in dev_params:
        flat_args.extend([w, b])

    out_shape = jax.ShapeDtypeStruct((B, embed_dim), jnp.float32)
    flops = 2 * B * sum(w.shape[0] * w.shape[1] for w, _ in dev_params)
    bytes_accessed = (x.size * x.dtype.itemsize
                      + B * embed_dim * 4
                      + weight_bytes)
    cost = pl.CostEstimate(flops=flops, transcendentals=0,
                           bytes_accessed=bytes_accessed)

    def run(single_buffered):
        in_specs = [pl.BlockSpec((tb, din), lambda i: (i, 0))]
        for w, b in dev_params:
            in_specs.append(_const_spec(w.shape, single_buffered))
            in_specs.append(_const_spec(b.shape, single_buffered))
        call = pl.pallas_call(
            kernel,
            out_shape=out_shape,
            grid=grid,
            in_specs=in_specs,
            out_specs=pl.BlockSpec((tb, embed_dim), lambda i: (i, 0)),
            compiler_params=pltpu.CompilerParams(
                dimension_semantics=("parallel",),
                vmem_limit_bytes=_VMEM_LIMIT_BYTES,
            ),
            cost_estimate=cost,
        )
        return call(*flat_args)

    try:
        return run(single_buffered=True)
    except Exception:
        # pipeline_mode=pl.Buffered(1) unsupported on this jax/libtpu build;
        # default double-buffering costs only a few extra KiB here.
        return run(single_buffered=False)


# --------------------------------------------------------------------------
# Plain-JAX reference (f32) for correctness checking.
# --------------------------------------------------------------------------
def encoder_forward_ref(x, params):
    h = x
    for (w, b) in params:
        h = jnp.maximum(h @ w + b, 0.0)
    return h


if __name__ == "__main__":
    # Small shapes consistent with the module's forward (pure MLP on 2-D input).
    batch = 8
    input_dim = 16
    hidden_dims = (32, 32)
    embed_dim = 8

    key = jax.random.PRNGKey(0)
    key, kx = jax.random.split(key)
    x = jax.random.normal(kx, (batch, input_dim), jnp.float32)

    params = init_encoder_params(key, input_dim, embed_dim, hidden_dims)
    dev_params = prepare_params(params)

    out = jax.block_until_ready(encoder_forward(x, dev_params))
    ref = encoder_forward_ref(x, params)
    assert out.shape == (batch, embed_dim), out.shape
    assert jnp.allclose(out, ref, atol=3e-2, rtol=3e-2), "mismatch vs reference"

    # Second check: ragged batch (exercises >=2 parallel grid steps and the
    # discarded out-of-bounds rows of the last tile).
    key, kx2 = jax.random.split(key)
    x2 = jax.random.normal(kx2, (37, input_dim), jnp.float32)
    out2 = jax.block_until_ready(encoder_forward(x2, dev_params))
    ref2 = encoder_forward_ref(x2, params)
    assert out2.shape == (37, embed_dim), out2.shape
    assert jnp.allclose(out2, ref2, atol=3e-2, rtol=3e-2), "ragged mismatch"

    print("KERNEL_OK")
</pallas_src>

<mosaic_0001>
module attributes {stable_mosaic.version = 11 : i64} {
  func.func @_mlp_kernel(%arg0: i32, %arg1: memref<8x16xf32, #tpu.memory_space<vmem>>, %arg2: memref<16x32xbf16, #tpu.memory_space<vmem>>, %arg3: memref<1x32xf32, #tpu.memory_space<vmem>>, %arg4: memref<32x32xbf16, #tpu.memory_space<vmem>>, %arg5: memref<1x32xf32, #tpu.memory_space<vmem>>, %arg6: memref<32x8xbf16, #tpu.memory_space<vmem>>, %arg7: memref<1x8xf32, #tpu.memory_space<vmem>>, %arg8: memref<8x8xf32, #tpu.memory_space<vmem>>) attributes {dimension_semantics = [#tpu.dimension_semantics<parallel>], iteration_bounds = array<i64: 1>, scalar_prefetch = 0 : i64, scratch_operands = 0 : i64, tpu.core_type = #tpu.core_type<tc>, window_params = [{transform_indices = @transform_0, window_bounds = array<i64: 8, 16>}, {pipeline_mode = #tpu.pipeline_mode<synchronous>, transform_indices = @transform_1, window_bounds = array<i64: 16, 32>}, {pipeline_mode = #tpu.pipeline_mode<synchronous>, transform_indices = @transform_2, window_bounds = array<i64: 1, 32>}, {pipeline_mode = #tpu.pipeline_mode<synchronous>, transform_indices = @transform_3, window_bounds = array<i64: 32, 32>}, {pipeline_mode = #tpu.pipeline_mode<synchronous>, transform_indices = @transform_4, window_bounds = array<i64: 1, 32>}, {pipeline_mode = #tpu.pipeline_mode<synchronous>, transform_indices = @transform_5, window_bounds = array<i64: 32, 8>}, {pipeline_mode = #tpu.pipeline_mode<synchronous>, transform_indices = @transform_6, window_bounds = array<i64: 1, 8>}, {transform_indices = @transform_7, window_bounds = array<i64: 8, 8>}]} {
    %c0 = arith.constant 0 : index
    %c0_0 = arith.constant 0 : index
    %0 = vector.load %arg1[%c0, %c0_0] : memref<8x16xf32, #tpu.memory_space<vmem>>, vector<8x16xf32>
    %1 = arith.truncf %0 : vector<8x16xf32> to vector<8x16xbf16>
    %c0_1 = arith.constant 0 : index
    %c0_2 = arith.constant 0 : index
    %2 = vector.load %arg2[%c0_1, %c0_2] : memref<16x32xbf16, #tpu.memory_space<vmem>>, vector<16x32xbf16>
    %cst = arith.constant dense<0.000000e+00> : vector<8x32xf32>
    %3 = tpu.matmul %1, %2, %cst {dimension_numbers = #tpu.dot_dimension_numbers<[1], [0], [0], [1], [0, 0, 1, 1], [], []>} : vector<8x16xbf16>, vector<16x32xbf16>, vector<8x32xf32> -> vector<8x32xf32>
    %c0_3 = arith.constant 0 : index
    %c0_4 = arith.constant 0 : index
    %4 = vector.load %arg3[%c0_3, %c0_4] : memref<1x32xf32, #tpu.memory_space<vmem>>, vector<1x32xf32>
    %5 = vector.broadcast %4 : vector<1x32xf32> to vector<8x32xf32>
    %6 = arith.addf %3, %5 : vector<8x32xf32>
    %cst_5 = arith.constant 0.000000e+00 : f32
    %7 = vector.broadcast %cst_5 : f32 to vector<8x32xf32>
    %8 = arith.maximumf %6, %7 : vector<8x32xf32>
    %9 = arith.truncf %8 : vector<8x32xf32> to vector<8x32xbf16>
    %c0_6 = arith.constant 0 : index
    %c0_7 = arith.constant 0 : index
    %10 = vector.load %arg4[%c0_6, %c0_7] : memref<32x32xbf16, #tpu.memory_space<vmem>>, vector<32x32xbf16>
    %cst_8 = arith.constant dense<0.000000e+00> : vector<8x32xf32>
    %11 = tpu.matmul %9, %10, %cst_8 {dimension_numbers = #tpu.dot_dimension_numbers<[1], [0], [0], [1], [0, 0, 1, 1], [], []>} : vector<8x32xbf16>, vector<32x32xbf16>, vector<8x32xf32> -> vector<8x32xf32>
    %c0_9 = arith.constant 0 : index
    %c0_10 = arith.constant 0 : index
    %12 = vector.load %arg5[%c0_9, %c0_10] : memref<1x32xf32, #tpu.memory_space<vmem>>, vector<1x32xf32>
    %13 = vector.broadcast %12 : vector<1x32xf32> to vector<8x32xf32>
    %14 = arith.addf %11, %13 : vector<8x32xf32>
    %cst_11 = arith.constant 0.000000e+00 : f32
    %15 = vector.broadcast %cst_11 : f32 to vector<8x32xf32>
    %16 = arith.maximumf %14, %15 : vector<8x32xf32>
    %17 = arith.truncf %16 : vector<8x32xf32> to vector<8x32xbf16>
    %c0_12 = arith.constant 0 : index
    %c0_13 = arith.constant 0 : index
    %18 = vector.load %arg6[%c0_12, %c0_13] : memref<32x8xbf16, #tpu.memory_space<vmem>>, vector<32x8xbf16>
    %cst_14 = arith.constant dense<0.000000e+00> : vector<8x8xf32>
    %19 = tpu.matmul %17, %18, %cst_14 {dimension_numbers = #tpu.dot_dimension_numbers<[1], [0], [0], [1], [0, 0, 1, 1], [], []>} : vector<8x32xbf16>, vector<32x8xbf16>, vector<8x8xf32> -> vector<8x8xf32>
    %c0_15 = arith.constant 0 : index
    %c0_16 = arith.constant 0 : index
    %20 = vector.load %arg7[%c0_15, %c0_16] : memref<1x8xf32, #tpu.memory_space<vmem>>, vector<1x8xf32>
    %21 = vector.broadcast %20 : vector<1x8xf32> to vector<8x8xf32>
    %22 = arith.addf %19, %21 : vector<8x8xf32>
    %cst_17 = arith.constant 0.000000e+00 : f32
    %23 = vector.broadcast %cst_17 : f32 to vector<8x8xf32>
    %24 = arith.maximumf %22, %23 : vector<8x8xf32>
    %c0_18 = arith.constant 0 : index
    %c0_19 = arith.constant 0 : index
    %25 = vector.load %arg8[%c0_18, %c0_19] : memref<8x8xf32, #tpu.memory_space<vmem>>, vector<8x8xf32>
    tpu.vector_store %arg8[%c0_18, %c0_19], %24 {strides = array<i32>} : memref<8x8xf32, #tpu.memory_space<vmem>>, vector<8x8xf32>,
    return
  }
  func.func @transform_0(%arg0: i32) -> (i32, i32) {
    %c0_i32 = arith.constant 0 : i32
    %c0_i32_0 = arith.constant 0 : i32
    return %arg0, %c0_i32 : i32, i32
  }
  func.func @transform_1(%arg0: i32) -> (i32, i32) {
    %c0_i32 = arith.constant 0 : i32
    %c0_i32_0 = arith.constant 0 : i32
    %c0_i32_1 = arith.constant 0 : i32
    return %c0_i32, %c0_i32_0 : i32, i32
  }
  func.func @transform_2(%arg0: i32) -> (i32, i32) {
    %c0_i32 = arith.constant 0 : i32
    %c0_i32_0 = arith.constant 0 : i32
    %c0_i32_1 = arith.constant 0 : i32
    return %c0_i32, %c0_i32_0 : i32, i32
  }
  func.func @transform_3(%arg0: i32) -> (i32, i32) {
    %c0_i32 = arith.constant 0 : i32
    %c0_i32_0 = arith.constant 0 : i32
    %c0_i32_1 = arith.constant 0 : i32
    return %c0_i32, %c0_i32_0 : i32, i32
  }
  func.func @transform_4(%arg0: i32) -> (i32, i32) {
    %c0_i32 = arith.constant 0 : i32
    %c0_i32_0 = arith.constant 0 : i32
    %c0_i32_1 = arith.constant 0 : i32
    return %c0_i32, %c0_i32_0 : i32, i32
  }
  func.func @transform_5(%arg0: i32) -> (i32, i32) {
    %c0_i32 = arith.constant 0 : i32
    %c0_i32_0 = arith.constant 0 : i32
    %c0_i32_1 = arith.constant 0 : i32
    return %c0_i32, %c0_i32_0 : i32, i32
  }
  func.func @transform_6(%arg0: i32) -> (i32, i32) {
    %c0_i32 = arith.constant 0 : i32
    %c0_i32_0 = arith.constant 0 : i32
    %c0_i32_1 = arith.constant 0 : i32
    return %c0_i32, %c0_i32_0 : i32, i32
  }
  func.func @transform_7(%arg0: i32) -> (i32, i32) {
    %c0_i32 = arith.constant 0 : i32
    %c0_i32_0 = arith.constant 0 : i32
    return %arg0, %c0_i32 : i32, i32
  }
}

module attributes {stable_mosaic.version = 11 : i64} {
  func.func @_mlp_kernel(%arg0: i32, %arg1: memref<8x16xf32, #tpu.memory_space<vmem>>, %arg2: memref<16x32xbf16, #tpu.memory_space<vmem>>, %arg3: memref<1x32xf32, #tpu.memory_space<vmem>>, %arg4: memref<32x32xbf16, #tpu.memory_space<vmem>>, %arg5: memref<1x32xf32, #tpu.memory_space<vmem>>, %arg6: memref<32x8xbf16, #tpu.memory_space<vmem>>, %arg7: memref<1x8xf32, #tpu.memory_space<vmem>>, %arg8: memref<8x8xf32, #tpu.memory_space<vmem>>) attributes {dimension_semantics = [#tpu.dimension_semantics<parallel>], iteration_bounds = array<i64: 1>, scalar_prefetch = 0 : i64, scratch_operands = 0 : i64, tpu.core_type = #tpu.core_type<tc>, window_params = [{transform_indices = @transform_0, window_bounds = array<i64: 8, 16>}, {pipeline_mode = #tpu.pipeline_mode<synchronous>, transform_indices = @transform_1, window_bounds = array<i64: 16, 32>}, {pipeline_mode = #tpu.pipeline_mode<synchronous>, transform_indices = @transform_2, window_bounds = array<i64: 1, 32>}, {pipeline_mode = #tpu.pipeline_mode<synchronous>, transform_indices = @transform_3, window_bounds = array<i64: 32, 32>}, {pipeline_mode = #tpu.pipeline_mode<synchronous>, transform_indices = @transform_4, window_bounds = array<i64: 1, 32>}, {pipeline_mode = #tpu.pipeline_mode<synchronous>, transform_indices = @transform_5, window_bounds = array<i64: 32, 8>}, {pipeline_mode = #tpu.pipeline_mode<synchronous>, transform_indices = @transform_6, window_bounds = array<i64: 1, 8>}, {transform_indices = @transform_7, window_bounds = array<i64: 8, 8>}]} {
    %c0 = arith.constant 0 : index
    %c0_0 = arith.constant 0 : index
    %0 = vector.load %arg1[%c0, %c0_0] : memref<8x16xf32, #tpu.memory_space<vmem>>, vector<8x16xf32>
    %1 = arith.truncf %0 : vector<8x16xf32> to vector<8x16xbf16>
    %c0_1 = arith.constant 0 : index
    %c0_2 = arith.constant 0 : index
    %2 = vector.load %arg2[%c0_1, %c0_2] : memref<16x32xbf16, #tpu.memory_space<vmem>>, vector<16x32xbf16>
    %cst = arith.constant dense<0.000000e+00> : vector<8x32xf32>
    %3 = tpu.matmul %1, %2, %cst {dimension_numbers = #tpu.dot_dimension_numbers<[1], [0], [0], [1], [0, 0, 1, 1], [], []>} : vector<8x16xbf16>, vector<16x32xbf16>, vector<8x32xf32> -> vector<8x32xf32>
    %c0_3 = arith.constant 0 : index
    %c0_4 = arith.constant 0 : index
    %4 = vector.load %arg3[%c0_3, %c0_4] : memref<1x32xf32, #tpu.memory_space<vmem>>, vector<1x32xf32>
    %5 = vector.broadcast %4 : vector<1x32xf32> to vector<8x32xf32>
    %6 = arith.addf %3, %5 : vector<8x32xf32>
    %cst_5 = arith.constant 0.000000e+00 : f32
    %7 = vector.broadcast %cst_5 : f32 to vector<8x32xf32>
    %8 = arith.maximumf %6, %7 : vector<8x32xf32>
    %9 = arith.truncf %8 : vector<8x32xf32> to vector<8x32xbf16>
    %c0_6 = arith.constant 0 : index
    %c0_7 = arith.constant 0 : index
    %10 = vector.load %arg4[%c0_6, %c0_7] : memref<32x32xbf16, #tpu.memory_space<vmem>>, vector<32x32xbf16>
    %cst_8 = arith.constant dense<0.000000e+00> : vector<8x32xf32>
    %11 = tpu.matmul %9, %10, %cst_8 {dimension_numbers = #tpu.dot_dimension_numbers<[1], [0], [0], [1], [0, 0, 1, 1], [], []>} : vector<8x32xbf16>, vector<32x32xbf16>, vector<8x32xf32> -> vector<8x32xf32>
    %c0_9 = arith.constant 0 : index
    %c0_10 = arith.constant 0 : index
    %12 = vector.load %arg5[%c0_9, %c0_10] : memref<1x32xf32, #tpu.memory_space<vmem>>, vector<1x32xf32>
    %13 = vector.broadcast %12 : vector<1x32xf32> to vector<8x32xf32>
    %14 = arith.addf %11, %13 : vector<8x32xf32>
    %cst_11 = arith.constant 0.000000e+00 : f32
    %15 = vector.broadcast %cst_11 : f32 to vector<8x32xf32>
    %16 = arith.maximumf %14, %15 : vector<8x32xf32>
    %17 = arith.truncf %16 : vector<8x32xf32> to vector<8x32xbf16>
    %c0_12 = arith.constant 0 : index
    %c0_13 = arith.constant 0 : index
    %18 = vector.load %arg6[%c0_12, %c0_13] : memref<32x8xbf16, #tpu.memory_space<vmem>>, vector<32x8xbf16>
    %cst_14 = arith.constant dense<0.000000e+00> : vector<8x8xf32>
    %19 = tpu.matmul %17, %18, %cst_14 {dimension_numbers = #tpu.dot_dimension_numbers<[1], [0], [0], [1], [0, 0, 1, 1], [], []>} : vector<8x32xbf16>, vector<32x8xbf16>, vector<8x8xf32> -> vector<8x8xf32>
    %c0_15 = arith.constant 0 : index
    %c0_16 = arith.constant 0 : index
    %20 = vector.load %arg7[%c0_15, %c0_16] : memref<1x8xf32, #tpu.memory_space<vmem>>, vector<1x8xf32>
    %21 = vector.broadcast %20 : vector<1x8xf32> to vector<8x8xf32>
    %22 = arith.addf %19, %21 : vector<8x8xf32>
    %cst_17 = arith.constant 0.000000e+00 : f32
    %23 = vector.broadcast %cst_17 : f32 to vector<8x8xf32>
    %24 = arith.maximumf %22, %23 : vector<8x8xf32>
    %c0_18 = arith.constant 0 : index
    %c0_19 = arith.constant 0 : index
    %25 = vector.load %arg8[%c0_18, %c0_19] : memref<8x8xf32, #tpu.memory_space<vmem>>, vector<8x8xf32>
    tpu.vector_store %arg8[%c0_18, %c0_19], %24 {strides = array<i32>} : memref<8x8xf32, #tpu.memory_space<vmem>>, vector<8x8xf32>,
    return
  }
  func.func @transform_0(%arg0: i32) -> (i32, i32) {
    %c0_i32 = arith.constant 0 : i32
    %c0_i32_0 = arith.constant 0 : i32
    return %arg0, %c0_i32 : i32, i32
  }
  func.func @transform_1(%arg0: i32) -> (i32, i32) {
    %c0_i32 = arith.constant 0 : i32
    %c0_i32_0 = arith.constant 0 : i32
    %c0_i32_1 = arith.constant 0 : i32
    return %c0_i32, %c0_i32_0 : i32, i32
  }
  func.func @transform_2(%arg0: i32) -> (i32, i32) {
    %c0_i32 = arith.constant 0 : i32
    %c0_i32_0 = arith.constant 0 : i32
    %c0_i32_1 = arith.constant 0 : i32
    return %c0_i32, %c0_i32_0 : i32, i32
  }
  func.func @transform_3(%arg0: i32) -> (i32, i32) {
    %c0_i32 = arith.constant 0 : i32
    %c0_i32_0 = arith.constant 0 : i32
    %c0_i32_1 = arith.constant 0 : i32
    return %c0_i32, %c0_i32_0 : i32, i32
  }
  func.func @transform_4(%arg0: i32) -> (i32, i32) {
    %c0_i32 = arith.constant 0 : i32
    %c0_i32_0 = arith.constant 0 : i32
    %c0_i32_1 = arith.constant 0 : i32
    return %c0_i32, %c0_i32_0 : i32, i32
  }
  func.func @transform_5(%arg0: i32) -> (i32, i32) {
    %c0_i32 = arith.constant 0 : i32
    %c0_i32_0 = arith.constant 0 : i32
    %c0_i32_1 = arith.constant 0 : i32
    return %c0_i32, %c0_i32_0 : i32, i32
  }
  func.func @transform_6(%arg0: i32) -> (i32, i32) {
    %c0_i32 = arith.constant 0 : i32
    %c0_i32_0 = arith.constant 0 : i32
    %c0_i32_1 = arith.constant 0 : i32
    return %c0_i32, %c0_i32_0 : i32, i32
  }
  func.func @transform_7(%arg0: i32) -> (i32, i32) {
    %c0_i32 = arith.constant 0 : i32
    %c0_i32_0 = arith.constant 0 : i32
    return %arg0, %c0_i32 : i32, i32
  }
}

</mosaic_0001>

<bundles_post_ra>
// kernel: tpu_custom_call.1
= control target key start
LH: loop header
LB: loop body
LE: loop exit
PB: predicated region body
PF: predicated region fallthrough
CT: control target
= control target key end

     0   :  { %12 = vsyncpa [#allocation3], 0  ;;  %s452_s0 = inlined_call_operand.vmem [shape: f32[8,16], index: 0, kind: input, shape index: {}]   ;;  %s453_s1 = inlined_call_operand.hbm [shape: bf16[16,32], index: 1, kind: input, shape index: {}]   ;;  %s454_s2 = inlined_call_operand.vmem [shape: f32[1,32], index: 2, kind: input, shape index: {}]   ;;  %s455_s3 = inlined_call_operand.vmem [shape: bf16[32,32], index: 3, kind: input, shape index: {}]   ;;  %s456_s4 = inlined_call_operand.vmem [shape: f32[1,32], index: 4, kind: input, shape index: {}]   ;;  %s457_s5 = inlined_call_operand.vmem [shape: bf16[32,8], index: 5, kind: input, shape index: {}]   ;;  %s458_s6 = inlined_call_operand.vmem [shape: f32[1,8], index: 6, kind: input, shape index: {}]   ;;  %s459_s7 = inlined_call_operand.hbm [shape: f32[8,8], index: 7, kind: output, shape index: {}]  }
   0x1   :  { %13 = vsyncpa [#allocation4], 0  ;;  %s358_s24 = smov [#allocation2]   ;;  %s310_s28 = scalar_lea.hbm %s453_s1, 128 }
   0x2   :  { %s21_s25 = sshll.u32 %s358_s24, 4  ;;  %p311_p0 = scmp.ne.s32.totalorder %s453_s1, %s310_s28  ;;  %s22_s25 = int_to_ptr.vmem [resolvable:$true] %s21_s25 }
   0x3   :  { %p314_p1 = scmp.lt.u32.totalorder %s310_s28, %s453_s1 }
   0x5   :  { %p316_p2 = pnand %p314_p1, %p311_p0 }
   0x7   :  { %319 = shalt.err (!%p316_p2)
}
   0x8   :  { %s320_s10 = scalar_lea.vmem %s22_s25, 128  ;;  %p325_p4 = scmp.lt.s32.totalorder %s22_s25, %s22_s25 }
   0x9   :  { %p321_p3 = scmp.ne.s32.totalorder %s22_s25, %s320_s10  ;;  %p326_p5 = scmp.lt.s32.totalorder %s320_s10, %s320_s10 }
   0xb   :  { %p327_p6 = por %p326_p5, %p325_p4 }
   0xd   :  { %p328_p7 = pnand %p327_p6, %p321_p3 }
   0xf   :  { %331 = shalt.err (!%p328_p7)
}
  0x10   :  { %s359_s11 = smov 64   ;;  %s360_s12 = smov 4  }
  0x11   :  { %27 = dma.hbm_to_vmem [thread:$0]  %s453_s1, 128, %s22_s25, [#allocation3], %s359_s11, %s359_s11, %s360_s12  }
  0x12   :  { %354 = dma.done.wait [#allocation3], 128  }
  0x13   :  { %355 = vsyncadd [#allocation3], 4294967168  ;;  %v361_v0 = vmov 0.0   ;;  %vm362_vm0 = vmmov 0   ;;  %v305_v1 = vld [vmem:[#allocation2] sm:$0xff]   ;;  %vm59_vm1 = vcmask 130048  }
  0x14   :  { %277 = vmatprep.subr.bf16.mxu0 %v361_v0  ;;  %279 = vmatprep.mubr.msk.bf16.mxu0 %vm362_vm0, %v361_v0  ;;  %v42_v2 = vld [vmem:[%s452_s0] sm:$0xff]  ;;  %v307_v5 = vld [vmem:[%s455_s3 + $0x8] sm:$0xff]   ;;  %vm128_vm2 = vcmask 261120   ;;  %s363_s27 = smov [#allocation5]   ;;  %vm241_vm3 = vcmask 64512  }
  0x15   :  { %283 = vmatprep.subr.bf16.mxu1 %v361_v0  ;;  %287 = vmatprep.mubr.msk.bf16.mxu1 %vm362_vm0, %v361_v0  ;;  %v43_v3 = vpack.c.bf16 %v42_v2, %v42_v2  ;;  %v306_v4 = vld [vmem:[%s455_s3] sm:$0xff]   ;;  %v309_v15 = vld [vmem:[%s457_s5 + $0x8] sm:$0xff]  }
  0x16   :  { %278 = vmatpush3.bf16.msra.mxu0 %v305_v1  ;;  %284 = vmatpush3.bf16.msra.mxu1 %v306_v4  ;;  %v308_v6 = vld [vmem:[%s457_s5] sm:$0xff]   ;;  %s249_s5 = sshll.u32 %s363_s27, 4  ;;  %s250_s5 = int_to_ptr.vmem [resolvable:$true] %s249_s5 }
  0x17   :  { %291 = vmatprep.subr.bf16.mxu0 %v361_v0  ;;  %285 = vmatprep.subr.bf16.mxu1 %v361_v0  ;;  %v258_v7 = vld [vmem:[%s454_s2] ss:$0 sm:$0xff]  ;;  %p337_p9 = scmp.lt.s32.totalorder %s250_s5, %s250_s5 }
  0x18   :  { %v261_v16 = vld [vmem:[%s456_s4] ss:$0 sm:$0xff]  ;;  %s332_s4 = scalar_lea.vmem %s250_s5, 128 }
  0x19   :  { %280 = vmatmul.mubr.msk.bf16.vlgmr.msra.gmra.mrb[0].mxu0 %vm59_vm1, %v43_v3  ;;  %v265_v24 = vld [vmem:[%s458_s6] ss:$0 sm:$0xff]  ;;  %p333_p8 = scmp.ne.s32.totalorder %s250_s5, %s332_s4  ;;  %p338_p10 = scmp.lt.s32.totalorder %s332_s4, %s332_s4 }
  0x1a   :  { %295 = vmatprep.mubr.msk.bf16.mxu0 %vm362_vm0, %v361_v0  ;;  %286 = vmatpush3.bf16.msra.mxu1 %v307_v5 }
  0x1b   :  { %292 = vmatpush3.bf16.msra.mxu0 %v308_v6  ;;  %p339_p11 = por %p338_p10, %p337_p9 }
  0x1c   :  { %293 = vmatprep.subr.bf16.mxu0 %v361_v0 }
  0x1d   :  { %p340_p12 = pnand %p339_p11, %p333_p8 }
  0x1f   :  { %294 = vmatpush3.bf16.msra.mxu0 %v309_v15 }
  0xec   :  { %v97_v8 = vpop.f32.mrb[0].mxu0 }
  0xed   :  { %v98_v9 = vadd.f32 %v258_v7, %v97_v8  ;;  %v281_v10 = vpop.f32.mrb[1].mxu0 }
  0xee   :  { %v100_v11 = vpop.f32.mrb[2].mxu0 }
  0xef   :  { %v103_v12 = vmax.f32 %v98_v9, 0.0  ;;  %v282_v13 = vpop.f32.mrb[3].mxu0 }
  0xf1   :  { %v104_v14 = vpack.c.bf16 %v103_v12, %v103_v12 }
  0xf3   :  { %288 = vmatmul.mubr.msk.bf16.vlgmr.msra.gmra.mrb[0].mxu1 %vm128_vm2, %v104_v14 }
 0x1c6   :  { %v166_v17 = vpop.f32.mrb[0].mxu1 }
 0x1c7   :  { %v167_v18 = vadd.f32 %v261_v16, %v166_v17  ;;  %v289_v19 = vpop.f32.mrb[1].mxu1 }
 0x1c8   :  { %v169_v20 = vpop.f32.mrb[2].mxu1 }
 0x1c9   :  { %v172_v21 = vmax.f32 %v167_v18, 0.0  ;;  %v290_v22 = vpop.f32.mrb[3].mxu1 }
 0x1cb   :  { %v173_v23 = vpack.c.bf16 %v172_v21, %v172_v21 }
 0x1cd   :  { %296 = vmatmul.mubr.msk.bf16.vlgmr.msra.gmra.mrb[4].mxu0 %vm128_vm2, %v173_v23 }
 0x2a0   :  { %v234_v25 = vpop.f32.mrb[4].mxu0 }
 0x2a1   :  { %v235_v26 = vadd.f32 %v265_v24, %v234_v25  ;;  %v297_v27 = vpop.f32.mrb[5].mxu0 }
 0x2a2   :  { %v237_v28 = vpop.f32.mrb[6].mxu0 }
 0x2a3   :  { %v240_v29 = vmax.f32 %v235_v26, 0.0  ;;  %v298_v30 = vpop.f32.mrb[7].mxu0 }
 0x2a5   :  { %242 = vst.msk [vmem:[#allocation5] sm:$0xff] %vm241_vm3, %v240_v29 }
 0x2a6   :  { %343 = shalt.err (!%p340_p12)
}
 0x2a7   :  { %s344_s29 = scalar_lea.hbm %s459_s7, 128 }
 0x2a8   :  { %p345_p13 = scmp.ne.s32.totalorder %s459_s7, %s344_s29  ;;  %p348_p0 = scmp.lt.u32.totalorder %s344_s29, %s459_s7 }
 0x2aa   :  { %p350_p1 = pnand %p348_p0, %p345_p13 }
 0x2ac   :  { %353 = shalt.err (!%p350_p1)
}
 0x2ad   :  { %252 = dma.vmem_to_hbm [thread:$0]  %s250_s5, 128, %s459_s7, [#allocation4]  }
 0x2ae   :  { %356 = dma.done.wait [#allocation4], 128  }
 0x2af   :  { %357 = vsyncadd [#allocation4], 4294967168 }
 0x2b0   :  { %256 = vsyncpa [#allocation3], 1 }
 0x2b1   :  { %257 = vsyncpa [#allocation4], 1 }

// kernel: tpu_custom_call.1
= control target key start
LH: loop header
LB: loop body
LE: loop exit
PB: predicated region body
PF: predicated region fallthrough
CT: control target
= control target key end

     0   :  { %12 = vsyncpa [#allocation3], 0  ;;  %s452_s0 = inlined_call_operand.vmem [shape: f32[8,16], index: 0, kind: input, shape index: {}]   ;;  %s453_s1 = inlined_call_operand.hbm [shape: bf16[16,32], index: 1, kind: input, shape index: {}]   ;;  %s454_s2 = inlined_call_operand.vmem [shape: f32[1,32], index: 2, kind: input, shape index: {}]   ;;  %s455_s3 = inlined_call_operand.vmem [shape: bf16[32,32], index: 3, kind: input, shape index: {}]   ;;  %s456_s4 = inlined_call_operand.vmem [shape: f32[1,32], index: 4, kind: input, shape index: {}]   ;;  %s457_s5 = inlined_call_operand.vmem [shape: bf16[32,8], index: 5, kind: input, shape index: {}]   ;;  %s458_s6 = inlined_call_operand.vmem [shape: f32[1,8], index: 6, kind: input, shape index: {}]   ;;  %s459_s7 = inlined_call_operand.hbm [shape: f32[8,8], index: 7, kind: output, shape index: {}]  }
   0x1   :  { %13 = vsyncpa [#allocation4], 0  ;;  %s358_s24 = smov [#allocation2]   ;;  %s310_s28 = scalar_lea.hbm %s453_s1, 128 }
   0x2   :  { %s21_s25 = sshll.u32 %s358_s24, 4  ;;  %p311_p0 = scmp.ne.s32.totalorder %s453_s1, %s310_s28  ;;  %s22_s25 = int_to_ptr.vmem [resolvable:$true] %s21_s25 }
   0x3   :  { %p314_p1 = scmp.lt.u32.totalorder %s310_s28, %s453_s1 }
   0x5   :  { %p316_p2 = pnand %p314_p1, %p311_p0 }
   0x7   :  { %319 = shalt.err (!%p316_p2)
}
   0x8   :  { %s320_s10 = scalar_lea.vmem %s22_s25, 128  ;;  %p325_p4 = scmp.lt.s32.totalorder %s22_s25, %s22_s25 }
   0x9   :  { %p321_p3 = scmp.ne.s32.totalorder %s22_s25, %s320_s10  ;;  %p326_p5 = scmp.lt.s32.totalorder %s320_s10, %s320_s10 }
   0xb   :  { %p327_p6 = por %p326_p5, %p325_p4 }
   0xd   :  { %p328_p7 = pnand %p327_p6, %p321_p3 }
   0xf   :  { %331 = shalt.err (!%p328_p7)
}
  0x10   :  { %s359_s11 = smov 64   ;;  %s360_s12 = smov 4  }
  0x11   :  { %27 = dma.hbm_to_vmem [thread:$0]  %s453_s1, 128, %s22_s25, [#allocation3], %s359_s11, %s359_s11, %s360_s12  }
  0x12   :  { %354 = dma.done.wait [#allocation3], 128  }
  0x13   :  { %355 = vsyncadd [#allocation3], 4294967168  ;;  %v361_v0 = vmov 0.0   ;;  %vm362_vm0 = vmmov 0   ;;  %v305_v1 = vld [vmem:[#allocation2] sm:$0xff]   ;;  %vm59_vm1 = vcmask 130048  }
  0x14   :  { %277 = vmatprep.subr.bf16.mxu0 %v361_v0  ;;  %279 = vmatprep.mubr.msk.bf16.mxu0 %vm362_vm0, %v361_v0  ;;  %v42_v2 = vld [vmem:[%s452_s0] sm:$0xff]  ;;  %v307_v5 = vld [vmem:[%s455_s3 + $0x8] sm:$0xff]   ;;  %vm128_vm2 = vcmask 261120   ;;  %s363_s27 = smov [#allocation5]   ;;  %vm241_vm3 = vcmask 64512  }
  0x15   :  { %283 = vmatprep.subr.bf16.mxu1 %v361_v0  ;;  %287 = vmatprep.mubr.msk.bf16.mxu1 %vm362_vm0, %v361_v0  ;;  %v43_v3 = vpack.c.bf16 %v42_v2, %v42_v2  ;;  %v306_v4 = vld [vmem:[%s455_s3] sm:$0xff]   ;;  %v309_v15 = vld [vmem:[%s457_s5 + $0x8] sm:$0xff]  }
  0x16   :  { %278 = vmatpush3.bf16.msra.mxu0 %v305_v1  ;;  %284 = vmatpush3.bf16.msra.mxu1 %v306_v4  ;;  %v308_v6 = vld [vmem:[%s457_s5] sm:$0xff]   ;;  %s249_s5 = sshll.u32 %s363_s27, 4  ;;  %s250_s5 = int_to_ptr.vmem [resolvable:$true] %s249_s5 }
  0x17   :  { %291 = vmatprep.subr.bf16.mxu0 %v361_v0  ;;  %285 = vmatprep.subr.bf16.mxu1 %v361_v0  ;;  %v258_v7 = vld [vmem:[%s454_s2] ss:$0 sm:$0xff]  ;;  %p337_p9 = scmp.lt.s32.totalorder %s250_s5, %s250_s5 }
  0x18   :  { %v261_v16 = vld [vmem:[%s456_s4] ss:$0 sm:$0xff]  ;;  %s332_s4 = scalar_lea.vmem %s250_s5, 128 }
  0x19   :  { %280 = vmatmul.mubr.msk.bf16.vlgmr.msra.gmra.mrb[0].mxu0 %vm59_vm1, %v43_v3  ;;  %v265_v24 = vld [vmem:[%s458_s6] ss:$0 sm:$0xff]  ;;  %p333_p8 = scmp.ne.s32.totalorder %s250_s5, %s332_s4  ;;  %p338_p10 = scmp.lt.s32.totalorder %s332_s4, %s332_s4 }
  0x1a   :  { %295 = vmatprep.mubr.msk.bf16.mxu0 %vm362_vm0, %v361_v0  ;;  %286 = vmatpush3.bf16.msra.mxu1 %v307_v5 }
  0x1b   :  { %292 = vmatpush3.bf16.msra.mxu0 %v308_v6  ;;  %p339_p11 = por %p338_p10, %p337_p9 }
  0x1c   :  { %293 = vmatprep.subr.bf16.mxu0 %v361_v0 }
  0x1d   :  { %p340_p12 = pnand %p339_p11, %p333_p8 }
  0x1f   :  { %294 = vmatpush3.bf16.msra.mxu0 %v309_v15 }
  0xec   :  { %v97_v8 = vpop.f32.mrb[0].mxu0 }
  0xed   :  { %v98_v9 = vadd.f32 %v258_v7, %v97_v8  ;;  %v281_v10 = vpop.f32.mrb[1].mxu0 }
  0xee   :  { %v100_v11 = vpop.f32.mrb[2].mxu0 }
  0xef   :  { %v103_v12 = vmax.f32 %v98_v9, 0.0  ;;  %v282_v13 = vpop.f32.mrb[3].mxu0 }
  0xf1   :  { %v104_v14 = vpack.c.bf16 %v103_v12, %v103_v12 }
  0xf3   :  { %288 = vmatmul.mubr.msk.bf16.vlgmr.msra.gmra.mrb[0].mxu1 %vm128_vm2, %v104_v14 }
 0x1c6   :  { %v166_v17 = vpop.f32.mrb[0].mxu1 }
 0x1c7   :  { %v167_v18 = vadd.f32 %v261_v16, %v166_v17  ;;  %v289_v19 = vpop.f32.mrb[1].mxu1 }
 0x1c8   :  { %v169_v20 = vpop.f32.mrb[2].mxu1 }
 0x1c9   :  { %v172_v21 = vmax.f32 %v167_v18, 0.0  ;;  %v290_v22 = vpop.f32.mrb[3].mxu1 }
 0x1cb   :  { %v173_v23 = vpack.c.bf16 %v172_v21, %v172_v21 }
 0x1cd   :  { %296 = vmatmul.mubr.msk.bf16.vlgmr.msra.gmra.mrb[4].mxu0 %vm128_vm2, %v173_v23 }
 0x2a0   :  { %v234_v25 = vpop.f32.mrb[4].mxu0 }
 0x2a1   :  { %v235_v26 = vadd.f32 %v265_v24, %v234_v25  ;;  %v297_v27 = vpop.f32.mrb[5].mxu0 }
 0x2a2   :  { %v237_v28 = vpop.f32.mrb[6].mxu0 }
 0x2a3   :  { %v240_v29 = vmax.f32 %v235_v26, 0.0  ;;  %v298_v30 = vpop.f32.mrb[7].mxu0 }
 0x2a5   :  { %242 = vst.msk [vmem:[#allocation5] sm:$0xff] %vm241_vm3, %v240_v29 }
 0x2a6   :  { %343 = shalt.err (!%p340_p12)
}
 0x2a7   :  { %s344_s29 = scalar_lea.hbm %s459_s7, 128 }
 0x2a8   :  { %p345_p13 = scmp.ne.s32.totalorder %s459_s7, %s344_s29  ;;  %p348_p0 = scmp.lt.u32.totalorder %s344_s29, %s459_s7 }
 0x2aa   :  { %p350_p1 = pnand %p348_p0, %p345_p13 }
 0x2ac   :  { %353 = shalt.err (!%p350_p1)
}
 0x2ad   :  { %252 = dma.vmem_to_hbm [thread:$0]  %s250_s5, 128, %s459_s7, [#allocation4]  }
 0x2ae   :  { %356 = dma.done.wait [#allocation4], 128  }
 0x2af   :  { %357 = vsyncadd [#allocation4], 4294967168 }
 0x2b0   :  { %256 = vsyncpa [#allocation3], 1 }
 0x2b1   :  { %257 = vsyncpa [#allocation4], 1 }

</bundles_post_ra>
